<compile_context>
chip_gen: v5e
topology: v5e:2x2
jax: 0.10.0
libtpu: 0.0.40
codegen_flags: <defaults>
</compile_context>

<pallas_src>
import jax
import jax.numpy as jnp
from jax.experimental import pallas as pl
from jax.experimental.pallas import tpu as pltpu

# ----------------------------- config ---------------------------------------
BATCH = 2
SEQ = 8
HIDDEN = 128          # lane-dense (multiple of 128)
LN_EPS = 1e-12


# ------------------------------- kernel --------------------------------------
def self_output_kernel(x_ref, res_ref, w_ref, vec_ref, out_ref):
    """Fused dense -> (+bias) -> dropout(eval)=identity -> +residual -> LayerNorm.

    x_ref   : (TILE_N, H) f32   hidden_states row tile
    res_ref : (TILE_N, H) f32   input_tensor (residual) row tile
    w_ref   : (H, H)      bf16  dense weight, (in, out) orientation, resident
    vec_ref : (3, H)      f32   row 0 = bias, row 1 = LN gamma, row 2 = LN beta
    out_ref : (TILE_N, H) f32
    """
    # MXU matmul with bf16 operands, f32 accumulation.
    y = jnp.dot(x_ref[...].astype(jnp.bfloat16), w_ref[...],
                preferred_element_type=jnp.float32)

    # bias add + residual add in f32; dropout (p>0 only in training) is identity.
    z = y + vec_ref[0:1, :] + res_ref[...]

    # LayerNorm(z), eps = 1e-12, all statistics in f32.
    mu = jnp.mean(z, axis=-1, keepdims=True)
    d = z - mu
    var = jnp.mean(d * d, axis=-1, keepdims=True)
    out = d * jax.lax.rsqrt(var + LN_EPS) * vec_ref[1:2, :] + vec_ref[2:3, :]

    out_ref[...] = out.astype(out_ref.dtype)


# ------------------------------ wrapper ---------------------------------------
def _tile_and_pad(n):
    """Pick a row tile (>=256 rows to fill the v6e/v7x MXU when N allows) and the
    padded token count so every tile is full-width / unmasked."""
    if n >= 256:
        tile = 256
    else:
        tile = max(8, -(-n // 8) * 8)       # round small N up to a multiple of 8
    n_pad = -(-n // tile) * tile
    return tile, n_pad


@jax.jit
def bert_self_output(hidden_states, input_tensor, params):
    """hidden_states, input_tensor: (B, S, H).

    params: dict with 'weight_bf16' (H,H) bf16 and 'vecs' (3,H) f32
    (packed once at init: [bias; gamma; beta])."""
    B, S, H = hidden_states.shape
    n = B * S
    x2 = hidden_states.reshape(n, H)
    r2 = input_tensor.reshape(n, H)

    tile_n, n_pad = _tile_and_pad(n)
    if n_pad != n:
        pad = ((0, n_pad - n), (0, 0))
        x2 = jnp.pad(x2, pad)
        r2 = jnp.pad(r2, pad)

    grid = (n_pad // tile_n,)

    # VMEM budget: double-buffered x/res/out row tiles (f32) + resident weight
    # (bf16, double-buffered allocation) + resident vec slab, with 2x headroom.
    tile_bytes = tile_n * H * 4
    vmem_needed = 3 * 2 * tile_bytes + 2 * (H * H * 2) + 2 * (3 * H * 4)
    vmem_limit = int(min(max(2 * vmem_needed, 16 << 20), 64 << 20))

    cost = pl.CostEstimate(
        flops=2 * n_pad * H * H + 8 * n_pad * H,
        transcendentals=n_pad,                                   # rsqrt per row
        bytes_accessed=3 * n_pad * H * 4 + H * H * 2 + 3 * H * 4,
    )

    out2 = pl.pallas_call(
        self_output_kernel,
        out_shape=jax.ShapeDtypeStruct((n_pad, H), hidden_states.dtype),
        grid_spec=pltpu.PrefetchScalarGridSpec(
            num_scalar_prefetch=0,
            grid=grid,
            in_specs=[
                pl.BlockSpec((tile_n, H), lambda i: (i, 0)),     # x row tile
                pl.BlockSpec((tile_n, H), lambda i: (i, 0)),     # residual row tile
                pl.BlockSpec((H, H), lambda i: (0, 0)),          # resident weight
                pl.BlockSpec((3, H), lambda i: (0, 0)),          # resident bias/gamma/beta
            ],
            out_specs=pl.BlockSpec((tile_n, H), lambda i: (i, 0)),
        ),
        input_output_aliases={0: 0},     # output reuses the (padded) x slab
        compiler_params=pltpu.CompilerParams(
            dimension_semantics=("parallel",),
            vmem_limit_bytes=vmem_limit,
        ),
        cost_estimate=cost,
    )(x2, r2, params["weight_bf16"], params["vecs"])

    return out2[:n].reshape(B, S, H)


# --------------------------- pure-JAX reference -------------------------------
def _ref_self_output(hidden_states, input_tensor, params, matmul_dtype=jnp.float32):
    x = hidden_states.astype(matmul_dtype)
    w = params["weight"].astype(matmul_dtype)
    y = jnp.dot(x, w, preferred_element_type=jnp.float32) + params["bias"]
    z = y + input_tensor                      # dropout identity (eval)
    mu = jnp.mean(z, axis=-1, keepdims=True)
    var = jnp.mean((z - mu) ** 2, axis=-1, keepdims=True)
    return (z - mu) * jax.lax.rsqrt(var + LN_EPS) * params["gamma"] + params["beta"]


# -------------------------------- main ----------------------------------------
def _init_params(key, H):
    kw, kb = jax.random.split(key, 2)
    scale = 0.02
    weight = scale * jax.random.normal(kw, (H, H), jnp.float32)   # (in, out)
    bias = scale * jax.random.normal(kb, (1, H), jnp.float32)
    gamma = jnp.ones((1, H), jnp.float32)
    beta = jnp.zeros((1, H), jnp.float32)
    return {
        "weight": weight,
        "bias": bias,
        "gamma": gamma,
        "beta": beta,
        # Packed once here (hoisted out of the jitted forward path):
        "weight_bf16": weight.astype(jnp.bfloat16),
        "vecs": jnp.concatenate([bias, gamma, beta], axis=0),      # (3, H)
    }


if __name__ == "__main__":
    key = jax.random.PRNGKey(0)
    k_x, k_r, k_p = jax.random.split(key, 3)

    hidden_states = jax.random.normal(k_x, (BATCH, SEQ, HIDDEN), jnp.float32)
    input_tensor = jax.random.normal(k_r, (BATCH, SEQ, HIDDEN), jnp.float32)
    params = _init_params(k_p, HIDDEN)

    out = bert_self_output(hidden_states, input_tensor, params)
    out = jax.block_until_ready(out)
    assert out.shape == (BATCH, SEQ, HIDDEN)

    # Tight check vs a reference using the same bf16 matmul operands.
    ref_bf16 = _ref_self_output(hidden_states, input_tensor, params,
                                matmul_dtype=jnp.bfloat16)
    err_bf16 = float(jnp.max(jnp.abs(out - ref_bf16)))
    assert err_bf16 < 5e-3, f"mismatch vs bf16-matched reference: {err_bf16}"

    # Loose check vs the full-f32 reference (bf16 matmul precision choice).
    ref_f32 = _ref_self_output(hidden_states, input_tensor, params)
    err_f32 = float(jnp.max(jnp.abs(out - ref_f32)))
    assert err_f32 < 5e-2, f"mismatch vs f32 reference: {err_f32}"

    print("KERNEL_OK")
</pallas_src>

<mosaic_0001>
module attributes {stable_mosaic.version = 11 : i64} {
  func.func @self_output_kernel(%arg0: i32, %arg1: memref<16x128xf32, #tpu.memory_space<vmem>>, %arg2: memref<16x128xf32, #tpu.memory_space<vmem>>, %arg3: memref<128x128xbf16, #tpu.memory_space<vmem>>, %arg4: memref<3x128xf32, #tpu.memory_space<vmem>>, %arg5: memref<16x128xf32, #tpu.memory_space<vmem>>) attributes {dimension_semantics = [#tpu.dimension_semantics<parallel>], iteration_bounds = array<i64: 1>, scalar_prefetch = 0 : i64, scratch_operands = 0 : i64, tpu.core_type = #tpu.core_type<tc>, window_params = [{transform_indices = @transform_0, window_bounds = array<i64: 16, 128>}, {transform_indices = @transform_1, window_bounds = array<i64: 16, 128>}, {pipeline_mode = #tpu.pipeline_mode<synchronous>, transform_indices = @transform_2, window_bounds = array<i64: 128, 128>}, {pipeline_mode = #tpu.pipeline_mode<synchronous>, transform_indices = @transform_3, window_bounds = array<i64: 3, 128>}, {transform_indices = @transform_4, window_bounds = array<i64: 16, 128>}]} {
    %c0 = arith.constant 0 : index
    %c0_0 = arith.constant 0 : index
    %0 = vector.load %arg1[%c0, %c0_0] : memref<16x128xf32, #tpu.memory_space<vmem>>, vector<16x128xf32>
    %1 = arith.truncf %0 : vector<16x128xf32> to vector<16x128xbf16>
    %c0_1 = arith.constant 0 : index
    %c0_2 = arith.constant 0 : index
    %2 = vector.load %arg3[%c0_1, %c0_2] : memref<128x128xbf16, #tpu.memory_space<vmem>>, vector<128x128xbf16>
    %cst = arith.constant dense<0.000000e+00> : vector<16x128xf32>
    %3 = tpu.matmul %1, %2, %cst {dimension_numbers = #tpu.dot_dimension_numbers<[1], [0], [0], [1], [0, 0, 1, 1], [], []>} : vector<16x128xbf16>, vector<128x128xbf16>, vector<16x128xf32> -> vector<16x128xf32>
    %c0_3 = arith.constant 0 : index
    %c0_4 = arith.constant 0 : index
    %4 = vector.load %arg4[%c0_3, %c0_4] : memref<3x128xf32, #tpu.memory_space<vmem>>, vector<1x128xf32>
    %5 = vector.broadcast %4 : vector<1x128xf32> to vector<16x128xf32>
    %6 = arith.addf %3, %5 : vector<16x128xf32>
    %c0_5 = arith.constant 0 : index
    %c0_6 = arith.constant 0 : index
    %7 = vector.load %arg2[%c0_5, %c0_6] : memref<16x128xf32, #tpu.memory_space<vmem>>, vector<16x128xf32>
    %8 = arith.addf %6, %7 : vector<16x128xf32>
    %cst_7 = arith.constant dense<0.000000e+00> : vector<16xf32>
    %9 = vector.multi_reduction <add>, %8, %cst_7 [1] : vector<16x128xf32> to vector<16xf32>
    %10 = vector.shape_cast %9 : vector<16xf32> to vector<16x1xf32>
    %cst_8 = arith.constant 1.280000e+02 : f32
    %11 = vector.broadcast %cst_8 : f32 to vector<16x1xf32>
    %12 = arith.divf %10, %11 : vector<16x1xf32>
    %13 = vector.broadcast %12 : vector<16x1xf32> to vector<16x128xf32>
    %14 = arith.subf %8, %13 : vector<16x128xf32>
    %15 = arith.mulf %14, %14 : vector<16x128xf32>
    %cst_9 = arith.constant dense<0.000000e+00> : vector<16xf32>
    %16 = vector.multi_reduction <add>, %15, %cst_9 [1] : vector<16x128xf32> to vector<16xf32>
    %17 = vector.shape_cast %16 : vector<16xf32> to vector<16x1xf32>
    %cst_10 = arith.constant 1.280000e+02 : f32
    %18 = vector.broadcast %cst_10 : f32 to vector<16x1xf32>
    %19 = arith.divf %17, %18 : vector<16x1xf32>
    %cst_11 = arith.constant 9.99999996E-13 : f32
    %20 = vector.broadcast %cst_11 : f32 to vector<16x1xf32>
    %21 = arith.addf %19, %20 : vector<16x1xf32>
    %22 = math.rsqrt %21 : vector<16x1xf32>
    %23 = vector.broadcast %22 : vector<16x1xf32> to vector<16x128xf32>
    %24 = arith.mulf %14, %23 : vector<16x128xf32>
    %c1 = arith.constant 1 : index
    %c0_12 = arith.constant 0 : index
    %25 = vector.load %arg4[%c1, %c0_12] : memref<3x128xf32, #tpu.memory_space<vmem>>, vector<1x128xf32>
    %26 = vector.broadcast %25 : vector<1x128xf32> to vector<16x128xf32>
    %27 = arith.mulf %24, %26 : vector<16x128xf32>
    %c2 = arith.constant 2 : index
    %c0_13 = arith.constant 0 : index
    %28 = vector.load %arg4[%c2, %c0_13] : memref<3x128xf32, #tpu.memory_space<vmem>>, vector<1x128xf32>
    %29 = vector.broadcast %28 : vector<1x128xf32> to vector<16x128xf32>
    %30 = arith.addf %27, %29 : vector<16x128xf32>
    %c0_14 = arith.constant 0 : index
    %c0_15 = arith.constant 0 : index
    %31 = vector.load %arg5[%c0_14, %c0_15] : memref<16x128xf32, #tpu.memory_space<vmem>>, vector<16x128xf32>
    tpu.vector_store %arg5[%c0_14, %c0_15], %30 {strides = array<i32>} : memref<16x128xf32, #tpu.memory_space<vmem>>, vector<16x128xf32>,
    return
  }
  func.func @transform_0(%arg0: i32) -> (i32, i32) {
    %c0_i32 = arith.constant 0 : i32
    %c0_i32_0 = arith.constant 0 : i32
    return %arg0, %c0_i32 : i32, i32
  }
  func.func @transform_1(%arg0: i32) -> (i32, i32) {
    %c0_i32 = arith.constant 0 : i32
    %c0_i32_0 = arith.constant 0 : i32
    return %arg0, %c0_i32 : i32, i32
  }
  func.func @transform_2(%arg0: i32) -> (i32, i32) {
    %c0_i32 = arith.constant 0 : i32
    %c0_i32_0 = arith.constant 0 : i32
    %c0_i32_1 = arith.constant 0 : i32
    return %c0_i32, %c0_i32_0 : i32, i32
  }
  func.func @transform_3(%arg0: i32) -> (i32, i32) {
    %c0_i32 = arith.constant 0 : i32
    %c0_i32_0 = arith.constant 0 : i32
    %c0_i32_1 = arith.constant 0 : i32
    return %c0_i32, %c0_i32_0 : i32, i32
  }
  func.func @transform_4(%arg0: i32) -> (i32, i32) {
    %c0_i32 = arith.constant 0 : i32
    %c0_i32_0 = arith.constant 0 : i32
    return %arg0, %c0_i32 : i32, i32
  }
}

</mosaic_0001>

<bundles_post_ra>
// kernel: bert_self_output.1
= control target key start
LH: loop header
LB: loop body
LE: loop exit
PB: predicated region body
PF: predicated region fallthrough
CT: control target
= control target key end

     0   :  { %9 = vsyncpa [#allocation3], 0  ;;  %s357_s0 = inlined_call_operand.vmem [shape: f32[16,128], index: 0, kind: input, shape index: {}, may-alias: {0,4}]   ;;  %s358_s1 = inlined_call_operand.vmem [shape: f32[16,128], index: 1, kind: input, shape index: {}]   ;;  %s359_s2 = inlined_call_operand.hbm [shape: bf16[128,128], index: 2, kind: input, shape index: {}]   ;;  %s360_s3 = inlined_call_operand.hbm [shape: f32[3,128], index: 3, kind: input, shape index: {}]   ;;  %s361_s4 = inlined_call_operand.vmem [shape: f32[16,128], index: 4, kind: output, shape index: {}, may-alias: {0,4}]  }
   0x1   :  { %s19_s17 = sshll.u32 %s359_s2, 4  ;;  %s20_s17 = int_to_ptr.hbm [resolvable:$true] %s19_s17 }
   0x2   :  { %10 = vsyncpa [#allocation5], 0  ;;  %s303_s18 = smov [#allocation2]   ;;  %s33_s22 = sshll.u32 %s360_s3, 4  ;;  %s34_s22 = int_to_ptr.hbm [resolvable:$true] %s33_s22 }
   0x3   :  { %s21_s19 = sshll.u32 %s303_s18, 4  ;;  %s304_s23 = smov 64   ;;  %s22_s19 = int_to_ptr.vmem [resolvable:$true] %s21_s19 }
   0x4   :  { %s305_s24 = smov 4   ;;  %s306_s25 = smov [#allocation4]  }
   0x5   :  { %27 = dma.hbm_to_vmem [thread:$0]  %s20_s17, 1024, %s22_s19, [#allocation3], %s304_s23, %s304_s23, %s305_s24  }
   0x6   :  { %s35_s26 = sshll.u32 %s306_s25, 4  ;;  %s36_s26 = int_to_ptr.vmem [resolvable:$true] %s35_s26 }
   0x7   :  { %38 = dma.hbm_to_vmem [thread:$0]  %s34_s22, 64, %s36_s26, [#allocation5]  }
   0x8   :  { %299 = dma.done.wait [#allocation3], 1024  }
   0x9   :  { %300 = vsyncadd [#allocation3], 4294966272 }
   0xa   :  { %301 = dma.done.wait [#allocation5], 64  }
   0xb   :  { %302 = vsyncadd [#allocation5], 4294967232  ;;  %v236_v0 = vld [vmem:[#allocation2 + $0x38] sm:$0xff]  ;;  %v235_v1 = vld [vmem:[#allocation2 + $0x30] sm:$0xff]  ;;  %v307_v20 = vmov 128.0  }
   0xc   :  { %116 = vmatpush.bf16.msra.mxu0 %v236_v0  ;;  %v234_v2 = vld [vmem:[#allocation2 + $0x28] sm:$0xff]  ;;  %v233_v3 = vld [vmem:[#allocation2 + $0x20] sm:$0xff]  ;;  %v232_v4 = vld [vmem:[#allocation2 + $0x18] sm:$0xff]  ;;  %245 = vrcp.f32 %v307_v20 }
   0xd   :  { %v231_v5 = vld [vmem:[#allocation2 + $0x10] sm:$0xff]  ;;  %v230_v6 = vld [vmem:[#allocation2 + $0x8] sm:$0xff]  ;;  %v229_v7 = vld [vmem:[#allocation2] sm:$0xff] }
   0xe   :  { %v47_v8 = vld [vmem:[%s357_s0] sm:$0xff]  ;;  %v48_v9 = vld [vmem:[%s357_s0 + $0x8] sm:$0xff] }
   0xf   :  { %v49_v10 = vpack.c.bf16 %v48_v9, %v47_v8  ;;  %v242_v11 = vld [vmem:[#allocation4] ss:$0 sm:$0xff]  ;;  %v131_v17 = vld [vmem:[%s358_s1 + $0x8] sm:$0xff]  ;;  %v243_v49 = vld [vmem:[#allocation4 + $0x1] ss:$0 sm:$0xff] }
  0x10   :  { %117 = vmatpush.bf16.msra.mxu0 %v235_v1  ;;  %v130_v13 = vld [vmem:[%s358_s1] sm:$0xff] }
  0x11   :  { %v244_v52 = vld [vmem:[#allocation4 + $0x2] ss:$0 sm:$0xff] }
  0x12   :  { %v246_v21 = vpop.eup %245 }
  0x13   :  { %v139_v22 = vmul.f32 128.0, %v246_v21  ;;  %vm143_vm0 = vweird.f32 %v246_v21 }
  0x14   :  { %118 = vmatpush.bf16.msra.mxu0 %v234_v2 }
  0x15   :  { %v140_v23 = vsub.f32 1.0, %v139_v22 }
  0x17   :  { %v141_v24 = vmul.f32 %v246_v21, %v140_v23 }
  0x18   :  { %119 = vmatpush.bf16.msra.mxu0 %v233_v3 }
  0x19   :  { %v142_v25 = vadd.f32 %v246_v21, %v141_v24 }
  0x1b   :  { %v144_v26 = vsel %vm143_vm0, %v246_v21, %v142_v25 }
  0x1c   :  { %120 = vmatpush.bf16.msra.mxu0 %v232_v4 }
  0x20   :  { %121 = vmatpush.bf16.msra.mxu0 %v231_v5 }
  0x24   :  { %122 = vmatpush.bf16.msra.mxu0 %v230_v6 }
  0x28   :  { %123 = vmatpush.bf16.msra.mxu0 %v229_v7 }
  0x2b   :  { %124 = vmatmul.bf16.vlgmr.msra.gmra.mxu0 %v49_v10 }
  0xa8   :  { %v125_v12 = vpop.f32.mrf.mxu0 }
  0xa9   :  { %v126_v14 = vadd.f32 %v242_v11, %v125_v12 }
  0xab   :  { %v132_v15 = vadd.f32 %v130_v13, %v126_v14 }
  0xad   :  { %134 = vadd.xlane.f32.xlu0 %v132_v15 }
  0xb0   :  { %v127_v16 = vpop.f32.mrf.mxu0 }
  0xb1   :  { %v128_v18 = vadd.f32 %v242_v11, %v127_v16 }
  0xb3   :  { %v133_v19 = vadd.f32 %v131_v17, %v128_v18 }
  0xb5   :  { %136 = vadd.xlane.f32.xlu0 %v133_v19 }
 0x120   :  { %v135_v27 = vpop.xlane.xlu0 %134 }
 0x121   :  { %v145_v28 = vmul.f32 %v144_v26, %v135_v27 }
 0x123   :  { %v147_v29 = vsub.f32 %v132_v15, %v145_v28 }
 0x125   :  { %v149_v30 = vmul.f32 %v147_v29, %v147_v29 }
 0x127   :  { %151 = vadd.xlane.f32.xlu1 %v149_v30 }
 0x128   :  { %v137_v31 = vpop.xlane.xlu0 %136 }
 0x129   :  { %v146_v32 = vmul.f32 %v144_v26, %v137_v31 }
 0x12b   :  { %v148_v33 = vsub.f32 %v133_v19, %v146_v32 }
 0x12d   :  { %v150_v34 = vmul.f32 %v148_v33, %v148_v33 }
 0x12f   :  { %153 = vadd.xlane.f32.xlu1 %v150_v34 }
 0x19a   :  { %v152_v35 = vpop.xlane.xlu1 %151 }
 0x19b   :  { %v155_v36 = vmul.f32 %v152_v35, %v144_v26 }
 0x19d   :  { %v157_v37 = vadd.f32 1e-12, %v155_v36 }
 0x19f   :  { %247 = vrsqrt.f32 %v157_v37  ;;  %vm165_vm2 = vweird.f32 %v157_v37 }
 0x1a2   :  { %v154_v38 = vpop.xlane.xlu1 %153 }
 0x1a3   :  { %v156_v39 = vmul.f32 %v154_v38, %v144_v26 }
 0x1a5   :  { %v248_v40 = vpop.eup %247  ;;  %v158_v41 = vadd.f32 1e-12, %v156_v39 }
 0x1a6   :  { %v160_v42 = vmul.f32 %v248_v40, %v157_v37  ;;  %vm166_vm1 = vweird.f32 %v248_v40 }
 0x1a7   :  { %249 = vrsqrt.f32 %v158_v41  ;;  %vm167_vm3 = vmor %vm165_vm2, %vm166_vm1  ;;  %vm175_vm5 = vweird.f32 %v158_v41 }
 0x1a8   :  { %v161_v43 = vmul.f32 %v248_v40, %v160_v42 }
 0x1aa   :  { %v162_v44 = vmul.f32 0.5, %v161_v43 }
 0x1ac   :  { %v163_v45 = vsub.f32 1.5, %v162_v44 }
 0x1ad   :  { %v250_v46 = vpop.eup %249 }
 0x1ae   :  { %v164_v47 = vmul.f32 %v248_v40, %v163_v45  ;;  %v170_v48 = vmul.f32 %v250_v46, %v158_v41  ;;  %vm176_vm4 = vweird.f32 %v250_v46 }
 0x1af   :  { %vm177_vm6 = vmor %vm175_vm5, %vm176_vm4 }
 0x1b0   :  { %v168_v50 = vsel %vm167_vm3, %v248_v40, %v164_v47  ;;  %v171_v51 = vmul.f32 %v250_v46, %v170_v48 }
 0x1b1   :  { %v179_v53 = vmul.f32 %v168_v50, %v147_v29 }
 0x1b2   :  { %v172_v54 = vmul.f32 0.5, %v171_v51 }
 0x1b3   :  { %v183_v55 = vmul.f32 %v243_v49, %v179_v53 }
 0x1b4   :  { %v173_v56 = vsub.f32 1.5, %v172_v54 }
 0x1b5   :  { %v187_v57 = vadd.f32 %v244_v52, %v183_v55 }
 0x1b6   :  { %v174_v58 = vmul.f32 %v250_v46, %v173_v56 }
 0x1b7   :  { %189 = vst [vmem:[%s361_s4] sm:$0xff] %v187_v57 }
 0x1b8   :  { %v178_v59 = vsel %vm177_vm6, %v250_v46, %v174_v58 }
 0x1b9   :  { %v180_v60 = vmul.f32 %v178_v59, %v148_v33 }
 0x1bb   :  { %v184_v61 = vmul.f32 %v243_v49, %v180_v60 }
 0x1bd   :  { %v188_v62 = vadd.f32 %v244_v52, %v184_v61 }
 0x1bf   :  { %190 = vst [vmem:[%s361_s4 + $0x8] sm:$0xff] %v188_v62 }
 0x1c0   :  { %195 = vsyncpa [#allocation3], 1 }
 0x1c1   :  { %196 = vsyncpa [#allocation5], 1 }

</bundles_post_ra>
